<compile_context>
chip_gen: v7x
topology: tpu7x:2x2x1
jax: 0.10.0
libtpu: 0.0.40
codegen_flags: <defaults>
</compile_context>

<pallas_src>
import math

import jax
import jax.numpy as jnp
from jax import lax
from jax.experimental import pallas as pl
from jax.experimental.pallas import tpu as pltpu


# ----------------------------- kernel ----------------------------------------


def _grn_kernel(x_ref, adj_ref, sm_ref, om_ref,
                wx_ref, bx_ref, wm_ref, bm_ref, wr_ref, wk_ref,
                h_ref,
                m_ref, v0_ref, v1_ref, ak_ref):
    """Fused GRNLayer forward.

    x_ref   : (U, B, D)  features, utterance-major
    adj_ref : (U, U, B)  adj[b, i, j]     stored as [i, j, b]
    sm_ref  : (U, U, B)  s_mask[b, i, j]  stored as [i, j, b]
    om_ref  : (U, U, B)  o_mask[b, i, j]  stored as [i, j, b]
    wx_ref  : (D, 6D)    [gru_c.W_ih^T | gru_p.W_hh^T]   (x_i side)
    bx_ref  : (1, 6D)    [gru_c.b_ih   | gru_p.b_hh  ]
    wm_ref  : (D, 6D)    [gru_c.W_hh^T | gru_p.W_ih^T]   (M side)
    bm_ref  : (1, 6D)    [gru_c.b_hh   | gru_p.b_ih  ]
    wr_ref  : (D, 2D)    [Wr0^T | Wr1^T]
    wk_ref  : (1, D)     K half of gat.linear.weight
    h_ref   : (U, B, D)  output H1 (utterance-major)
    scratch : m_ref (B, D), v0_ref/v1_ref (U, B, D), ak_ref (U, B, 1)
    """
    U, B, D = x_ref.shape
    D3 = 3 * D

    # VMEM scratch is uninitialized -> zero the recurrent state and the caches
    # (rows >= current step are touched only with zero coefficients).
    m_ref[...] = jnp.zeros_like(m_ref)
    v0_ref[...] = jnp.zeros_like(v0_ref)
    v1_ref[...] = jnp.zeros_like(v1_ref)
    ak_ref[...] = jnp.zeros_like(ak_ref)

    # weights stay resident for the whole recurrence
    wx = wx_ref[...]
    bx = bx_ref[...]
    wm = wm_ref[...]
    bm = bm_ref[...]
    wr = wr_ref[...]
    wk = wk_ref[...]

    def gru(gi, gh, h):
        r = jax.nn.sigmoid(gi[:, :D] + gh[:, :D])
        z = jax.nn.sigmoid(gi[:, D:2 * D] + gh[:, D:2 * D])
        n = jnp.tanh(gi[:, 2 * D:] + r * gh[:, 2 * D:])
        return n + z * (h - n)            # == (1 - z) * n + z * h

    @pl.loop(0, U)
    def _step(i):
        x_i = x_ref[i]                                        # (B, D)

        # ---- GraphAttention over the already-built prefix H[:, :i] ---------
        @pl.when(i > 0)
        def _attend():
            # alpha[j, b] = w_k . H_j   (Q half + bias are constant along the
            # softmax axis j, hence cancel -- softmax shift invariance).
            alpha = ak_ref[...][:, :, 0]                      # (U, B)
            alpha = alpha - (1.0 - adj_ref[i]) * 1e30         # mask_logic
            pos = lax.broadcasted_iota(jnp.int32, (U, B), 0)
            alpha = jnp.where(pos < i, alpha, -jnp.inf)       # restrict to prefix
            amax = jnp.max(alpha, axis=0, keepdims=True)      # (1, B)
            e = jnp.exp(alpha - amax)
            w = e / jnp.sum(e, axis=0, keepdims=True)         # softmax, (U, B)
            c0 = (w * sm_ref[i])[:, :, None]                  # (U, B, 1)
            c1 = (w * om_ref[i])[:, :, None]
            m_ref[...] = jnp.sum(c0 * v0_ref[...] + c1 * v1_ref[...], axis=0)

        m = m_ref[...]                                        # (B, D); zeros at i == 0

        # ---- two GRU cells fused into two lane-dense matmuls ----------------
        gx = jnp.dot(x_i, wx, preferred_element_type=jnp.float32) + bx   # (B, 6D)
        gm = jnp.dot(m, wm, preferred_element_type=jnp.float32) + bm     # (B, 6D)
        c = gru(gx[:, :D3], gm[:, :D3], m)        # C = gru_c(x_i, M)
        p = gru(gm[:, D3:], gx[:, D3:], x_i)      # P = gru_p(M,  x_i)
        h_i = c + p
        h_ref[i] = h_i

        # ---- incrementally extend the attention caches with the new row -----
        v01 = jnp.dot(h_i, wr, preferred_element_type=jnp.float32)       # (B, 2D)
        v0_ref[i] = v01[:, :D]                                # Wr0(H_i)
        v1_ref[i] = v01[:, D:]                                # Wr1(H_i)
        ak_ref[i] = jnp.sum(h_i * wk, axis=-1, keepdims=True)  # (B, 1)


# ----------------------------- wrapper ----------------------------------------


@jax.jit
def grn_forward(params, features, adj, s_mask, o_mask):
    """GRNLayer.forward.  features: (B, U, D); adj/s_mask/o_mask: (B, U, U)."""
    f32 = jnp.float32
    B, U, D = features.shape

    # utterance-major layouts so the kernel only ever indexes the leading axis
    x_t = jnp.transpose(features.astype(f32), (1, 0, 2))          # (U, B, D)
    adj_t = jnp.transpose(adj.astype(f32), (1, 2, 0))             # (U, U, B)
    sm_t = jnp.transpose(s_mask.astype(f32), (1, 2, 0))
    om_t = jnp.transpose(o_mask.astype(f32), (1, 2, 0))

    # packed weights (see kernel docstring)
    wx = jnp.concatenate([params["wc_ih"].T, params["wp_hh"].T], axis=1)   # (D, 6D)
    bx = jnp.concatenate([params["bc_ih"], params["bp_hh"]]).reshape(1, 6 * D)
    wm = jnp.concatenate([params["wc_hh"].T, params["wp_ih"].T], axis=1)   # (D, 6D)
    bm = jnp.concatenate([params["bc_hh"], params["bp_ih"]]).reshape(1, 6 * D)
    wr = jnp.concatenate([params["wr0"].T, params["wr1"].T], axis=1)       # (D, 2D)
    wk = params["att_w"][:, D:].reshape(1, D)                              # K half

    vmem = pl.BlockSpec(memory_space=pltpu.MemorySpace.VMEM)

    # TODO(synk): for large batch, grid over batch blocks with
    # dimension_semantics=("parallel",) so v7x's 2 TensorCores both work; at
    # B=2 (and with the inherently sequential utterance loop) one resident
    # invocation is optimal.
    h_t = pl.pallas_call(
        _grn_kernel,
        out_shape=jax.ShapeDtypeStruct((U, B, D), f32),
        in_specs=[vmem] * 10,
        out_specs=vmem,
        scratch_shapes=[
            pltpu.VMEM((B, D), f32),      # M (attention summary)
            pltpu.VMEM((U, B, D), f32),   # cached Wr0(H_j)
            pltpu.VMEM((U, B, D), f32),   # cached Wr1(H_j)
            pltpu.VMEM((U, B, 1), f32),   # cached w_k . H_j
        ],
    )(x_t, adj_t, sm_t, om_t, wx, bx, wm, bm, wr, wk)

    return jnp.transpose(h_t, (1, 0, 2))                          # (B, U, D)


# ----------------------------- params & reference ------------------------------


def init_params(key, d):
    ks = jax.random.split(key, 12)

    def u(k, shape, bound):
        return jax.random.uniform(k, shape, jnp.float32, -bound, bound)

    bg = 1.0 / math.sqrt(d)
    ba = 1.0 / math.sqrt(2 * d)
    return dict(
        wc_ih=u(ks[0], (3 * d, d), bg), wc_hh=u(ks[1], (3 * d, d), bg),
        bc_ih=u(ks[2], (3 * d,), bg), bc_hh=u(ks[3], (3 * d,), bg),
        wp_ih=u(ks[4], (3 * d, d), bg), wp_hh=u(ks[5], (3 * d, d), bg),
        bp_ih=u(ks[6], (3 * d,), bg), bp_hh=u(ks[7], (3 * d,), bg),
        att_w=u(ks[8], (1, 2 * d), ba), att_b=u(ks[9], (1,), ba),
        wr0=u(ks[10], (d, d), bg), wr1=u(ks[11], (d, d), bg),
    )


def _gru_cell_ref(x, h, w_ih, w_hh, b_ih, b_hh):
    gi = x @ w_ih.T + b_ih
    gh = h @ w_hh.T + b_hh
    i_r, i_z, i_n = jnp.split(gi, 3, axis=-1)
    h_r, h_z, h_n = jnp.split(gh, 3, axis=-1)
    r = jax.nn.sigmoid(i_r + h_r)
    z = jax.nn.sigmoid(i_z + h_z)
    n = jnp.tanh(i_n + r * h_n)
    return (1.0 - z) * n + z * h


def _gat_ref(p, q, k, v, adj, s_mask, o_mask):
    b, n, d = k.shape
    qe = jnp.broadcast_to(q[:, None, :], (b, n, d))
    x = jnp.concatenate([qe, k], axis=2)
    alpha = (x @ p["att_w"].T + p["att_b"]).transpose(0, 2, 1)     # (B, 1, N)
    alpha = alpha - (1.0 - adj[:, None, :]) * 1e30                 # mask_logic
    w = jax.nn.softmax(alpha, axis=2)
    v0 = v @ p["wr0"].T
    v1 = v @ p["wr1"].T
    vm = v0 * s_mask[:, :, None] + v1 * o_mask[:, :, None]
    return jnp.squeeze(w @ vm, axis=1)                              # (B, D)


def reference_forward(p, features, adj, s_mask, o_mask):
    b, u, d = features.shape
    zeros = jnp.zeros((b, d), jnp.float32)
    c = _gru_cell_ref(features[:, 0], zeros, p["wc_ih"], p["wc_hh"], p["bc_ih"], p["bc_hh"])
    m = jnp.zeros_like(c)
    pp = _gru_cell_ref(m, features[:, 0], p["wp_ih"], p["wp_hh"], p["bp_ih"], p["bp_hh"])
    h = (c + pp)[:, None, :]
    for i in range(1, u):
        m = _gat_ref(p, features[:, i], h, h,
                     adj[:, i, :i], s_mask[:, i, :i], o_mask[:, i, :i])
        c = _gru_cell_ref(features[:, i], m, p["wc_ih"], p["wc_hh"], p["bc_ih"], p["bc_hh"])
        pp = _gru_cell_ref(m, features[:, i], p["wp_ih"], p["wp_hh"], p["bp_ih"], p["bp_hh"])
        h = jnp.concatenate([h, (c + pp)[:, None, :]], axis=1)
    return h


# ----------------------------- main -------------------------------------------


if __name__ == "__main__":
    key = jax.random.PRNGKey(0)
    B, U, D = 2, 8, 32                       # batch, num_utter, hidden(=input) size
    kf, ka, ks_, kp = jax.random.split(key, 4)

    features = jax.random.normal(kf, (B, U, D), jnp.float32)
    adj = (jax.random.uniform(ka, (B, U, U)) > 0.4).astype(jnp.float32)
    adj = adj.at[:, :, 0].set(1.0)           # every utterance attends to utterance 0
    s_mask = (jax.random.uniform(ks_, (B, U, U)) > 0.5).astype(jnp.float32)
    o_mask = 1.0 - s_mask

    params = init_params(kp, D)

    out = grn_forward(params, features, adj, s_mask, o_mask)
    out = jax.block_until_ready(out)

    ref = reference_forward(params, features, adj, s_mask, o_mask)
    assert out.shape == (B, U, D)
    err = float(jnp.max(jnp.abs(out - ref)))
    assert jnp.allclose(out, ref, atol=2e-4, rtol=2e-4), f"max abs err {err}"

    print("KERNEL_OK")
</pallas_src>

<mosaic_0001>
module attributes {stable_mosaic.version = 11 : i64} {
  func.func @_grn_kernel(%arg0: memref<8x2x32xf32, #tpu.memory_space<vmem>>, %arg1: memref<8x8x2xf32, #tpu.memory_space<vmem>>, %arg2: memref<8x8x2xf32, #tpu.memory_space<vmem>>, %arg3: memref<8x8x2xf32, #tpu.memory_space<vmem>>, %arg4: memref<32x192xf32, #tpu.memory_space<vmem>>, %arg5: memref<1x192xf32, #tpu.memory_space<vmem>>, %arg6: memref<32x192xf32, #tpu.memory_space<vmem>>, %arg7: memref<1x192xf32, #tpu.memory_space<vmem>>, %arg8: memref<32x64xf32, #tpu.memory_space<vmem>>, %arg9: memref<1x32xf32, #tpu.memory_space<vmem>>, %arg10: memref<8x2x32xf32, #tpu.memory_space<vmem>>, %arg11: memref<2x32xf32, #tpu.memory_space<vmem>>, %arg12: memref<8x2x32xf32, #tpu.memory_space<vmem>>, %arg13: memref<8x2x32xf32, #tpu.memory_space<vmem>>, %arg14: memref<8x2x1xf32, #tpu.memory_space<vmem>>) attributes {dimension_semantics = [], scalar_prefetch = 0 : i64, scratch_operands = 4 : i64, tpu.core_type = #tpu.core_type<tc>} {
    %cst = arith.constant 0.000000e+00 : f32
    %0 = vector.broadcast %cst : f32 to vector<2x32xf32>
    %c0 = arith.constant 0 : index
    %c0_0 = arith.constant 0 : index
    %1 = vector.load %arg11[%c0, %c0_0] : memref<2x32xf32, #tpu.memory_space<vmem>>, vector<2x32xf32>
    tpu.vector_store %arg11[%c0, %c0_0], %0 {strides = array<i32>} : memref<2x32xf32, #tpu.memory_space<vmem>>, vector<2x32xf32>,
    %cst_1 = arith.constant 0.000000e+00 : f32
    %2 = vector.broadcast %cst_1 : f32 to vector<8x2x32xf32>
    %c0_2 = arith.constant 0 : index
    %c0_3 = arith.constant 0 : index
    %c0_4 = arith.constant 0 : index
    %3 = vector.load %arg12[%c0_2, %c0_3, %c0_4] : memref<8x2x32xf32, #tpu.memory_space<vmem>>, vector<8x2x32xf32>
    tpu.vector_store %arg12[%c0_2, %c0_3, %c0_4], %2 {strides = array<i32>} : memref<8x2x32xf32, #tpu.memory_space<vmem>>, vector<8x2x32xf32>,
    %cst_5 = arith.constant 0.000000e+00 : f32
    %4 = vector.broadcast %cst_5 : f32 to vector<8x2x32xf32>
    %c0_6 = arith.constant 0 : index
    %c0_7 = arith.constant 0 : index
    %c0_8 = arith.constant 0 : index
    %5 = vector.load %arg13[%c0_6, %c0_7, %c0_8] : memref<8x2x32xf32, #tpu.memory_space<vmem>>, vector<8x2x32xf32>
    tpu.vector_store %arg13[%c0_6, %c0_7, %c0_8], %4 {strides = array<i32>} : memref<8x2x32xf32, #tpu.memory_space<vmem>>, vector<8x2x32xf32>,
    %cst_9 = arith.constant 0.000000e+00 : f32
    %6 = vector.broadcast %cst_9 : f32 to vector<8x2x1xf32>
    %c0_10 = arith.constant 0 : index
    %c0_11 = arith.constant 0 : index
    %c0_12 = arith.constant 0 : index
    %7 = vector.load %arg14[%c0_10, %c0_11, %c0_12] : memref<8x2x1xf32, #tpu.memory_space<vmem>>, vector<8x2x1xf32>
    tpu.vector_store %arg14[%c0_10, %c0_11, %c0_12], %6 {strides = array<i32>} : memref<8x2x1xf32, #tpu.memory_space<vmem>>, vector<8x2x1xf32>,
    %c0_13 = arith.constant 0 : index
    %c0_14 = arith.constant 0 : index
    %8 = vector.load %arg4[%c0_13, %c0_14] : memref<32x192xf32, #tpu.memory_space<vmem>>, vector<32x192xf32>
    %c0_15 = arith.constant 0 : index
    %c0_16 = arith.constant 0 : index
    %9 = vector.load %arg5[%c0_15, %c0_16] : memref<1x192xf32, #tpu.memory_space<vmem>>, vector<1x192xf32>
    %c0_17 = arith.constant 0 : index
    %c0_18 = arith.constant 0 : index
    %10 = vector.load %arg6[%c0_17, %c0_18] : memref<32x192xf32, #tpu.memory_space<vmem>>, vector<32x192xf32>
    %c0_19 = arith.constant 0 : index
    %c0_20 = arith.constant 0 : index
    %11 = vector.load %arg7[%c0_19, %c0_20] : memref<1x192xf32, #tpu.memory_space<vmem>>, vector<1x192xf32>
    %c0_21 = arith.constant 0 : index
    %c0_22 = arith.constant 0 : index
    %12 = vector.load %arg8[%c0_21, %c0_22] : memref<32x64xf32, #tpu.memory_space<vmem>>, vector<32x64xf32>
    %c0_23 = arith.constant 0 : index
    %c0_24 = arith.constant 0 : index
    %13 = vector.load %arg9[%c0_23, %c0_24] : memref<1x32xf32, #tpu.memory_space<vmem>>, vector<1x32xf32>
    %c0_i32 = arith.constant 0 : i32
    %c8_i32 = arith.constant 8 : i32
    %14 = arith.addi %c0_i32, %c8_i32 : i32
    %c1_i32 = arith.constant 1 : i32
    scf.for %arg15 = %c0_i32 to %14 step %c1_i32  : i32 {
      %c1_i32_26 = arith.constant 1 : i32
      %15 = arith.muli %arg15, %c1_i32_26 : i32
      %c0_i32_27 = arith.constant 0 : i32
      %16 = arith.addi %c0_i32_27, %15 : i32
      %17 = arith.index_cast %16 : i32 to index
      %c0_28 = arith.constant 0 : index
      %c0_29 = arith.constant 0 : index
      %18 = vector.load %arg0[%17, %c0_28, %c0_29] : memref<8x2x32xf32, #tpu.memory_space<vmem>>, vector<1x2x32xf32>
      %19 = vector.shape_cast %18 : vector<1x2x32xf32> to vector<2x32xf32>
      %c0_i32_30 = arith.constant 0 : i32
      %20 = arith.cmpi sgt, %16, %c0_i32_30 : i32
      %21 = arith.extui %20 : i1 to i32
      %c0_i32_31 = arith.constant 0 : i32
      %22 = arith.cmpi ne, %21, %c0_i32_31 : i32
      scf.if %22 {
        %c0_50 = arith.constant 0 : index
        %c0_51 = arith.constant 0 : index
        %c0_52 = arith.constant 0 : index
        %106 = vector.load %arg14[%c0_50, %c0_51, %c0_52] : memref<8x2x1xf32, #tpu.memory_space<vmem>>, vector<8x2x1xf32>
        %107 = vector.shape_cast %106 : vector<8x2x1xf32> to vector<8x2xf32>
        %108 = arith.index_cast %16 : i32 to index
        %c0_53 = arith.constant 0 : index
        %c0_54 = arith.constant 0 : index
        %109 = vector.load %arg1[%108, %c0_53, %c0_54] : memref<8x8x2xf32, #tpu.memory_space<vmem>>, vector<1x8x2xf32>
        %110 = vector.shape_cast %109 : vector<1x8x2xf32> to vector<8x2xf32>
        %cst_55 = arith.constant 1.000000e+00 : f32
        %111 = vector.broadcast %cst_55 : f32 to vector<8x2xf32>
        %112 = arith.subf %111, %110 : vector<8x2xf32>
        %cst_56 = arith.constant 1.000000e+30 : f32
        %113 = vector.broadcast %cst_56 : f32 to vector<8x2xf32>
        %114 = arith.mulf %112, %113 : vector<8x2xf32>
        %115 = arith.subf %107, %114 : vector<8x2xf32>
        %116 = tpu.iota {dimensions = array<i32: 0>} : vector<8x2xi32>
        %117 = vector.broadcast %16 : i32 to vector<8x2xi32>
        %118 = arith.cmpi slt, %116, %117 : vector<8x2xi32>
        %cst_57 = arith.constant 0xFF800000 : f32
        %119 = vector.broadcast %cst_57 : f32 to vector<8x2xf32>
        %120 = arith.select %118, %115, %119 : vector<8x2xi1>, vector<8x2xf32>
        %cst_58 = arith.constant dense<0xFF800000> : vector<2xf32>
        %121 = vector.multi_reduction <maximumf>, %120, %cst_58 [0] : vector<8x2xf32> to vector<2xf32>
        %122 = vector.shape_cast %121 : vector<2xf32> to vector<1x2xf32>
        %123 = vector.broadcast %122 : vector<1x2xf32> to vector<8x2xf32>
        %124 = arith.subf %120, %123 : vector<8x2xf32>
        %125 = math.exp %124 : vector<8x2xf32>
        %cst_59 = arith.constant dense<0.000000e+00> : vector<2xf32>
        %126 = vector.multi_reduction <add>, %125, %cst_59 [0] : vector<8x2xf32> to vector<2xf32>
        %127 = vector.shape_cast %126 : vector<2xf32> to vector<1x2xf32>
        %128 = vector.broadcast %127 : vector<1x2xf32> to vector<8x2xf32>
        %129 = arith.divf %125, %128 : vector<8x2xf32>
        %130 = arith.index_cast %16 : i32 to index
        %c0_60 = arith.constant 0 : index
        %c0_61 = arith.constant 0 : index
        %131 = vector.load %arg2[%130, %c0_60, %c0_61] : memref<8x8x2xf32, #tpu.memory_space<vmem>>, vector<1x8x2xf32>
        %132 = vector.shape_cast %131 : vector<1x8x2xf32> to vector<8x2xf32>
        %133 = arith.mulf %129, %132 : vector<8x2xf32>
        %134 = vector.shape_cast %133 : vector<8x2xf32> to vector<8x2x1xf32>
        %135 = arith.index_cast %16 : i32 to index
        %c0_62 = arith.constant 0 : index
        %c0_63 = arith.constant 0 : index
        %136 = vector.load %arg3[%135, %c0_62, %c0_63] : memref<8x8x2xf32, #tpu.memory_space<vmem>>, vector<1x8x2xf32>
        %137 = vector.shape_cast %136 : vector<1x8x2xf32> to vector<8x2xf32>
        %138 = arith.mulf %129, %137 : vector<8x2xf32>
        %139 = vector.shape_cast %138 : vector<8x2xf32> to vector<8x2x1xf32>
        %c0_64 = arith.constant 0 : index
        %c0_65 = arith.constant 0 : index
        %c0_66 = arith.constant 0 : index
        %140 = vector.load %arg12[%c0_64, %c0_65, %c0_66] : memref<8x2x32xf32, #tpu.memory_space<vmem>>, vector<8x2x32xf32>
        %141 = vector.broadcast %134 : vector<8x2x1xf32> to vector<8x2x32xf32>
        %142 = arith.mulf %141, %140 : vector<8x2x32xf32>
        %c0_67 = arith.constant 0 : index
        %c0_68 = arith.constant 0 : index
        %c0_69 = arith.constant 0 : index
        %143 = vector.load %arg13[%c0_67, %c0_68, %c0_69] : memref<8x2x32xf32, #tpu.memory_space<vmem>>, vector<8x2x32xf32>
        %144 = vector.broadcast %139 : vector<8x2x1xf32> to vector<8x2x32xf32>
        %145 = arith.mulf %144, %143 : vector<8x2x32xf32>
        %146 = arith.addf %142, %145 : vector<8x2x32xf32>
        %cst_70 = arith.constant dense<0.000000e+00> : vector<2x32xf32>
        %147 = vector.multi_reduction <add>, %146, %cst_70 [0] : vector<8x2x32xf32> to vector<2x32xf32>
        %c0_71 = arith.constant 0 : index
        %c0_72 = arith.constant 0 : index
        %148 = vector.load %arg11[%c0_71, %c0_72] : memref<2x32xf32, #tpu.memory_space<vmem>>, vector<2x32xf32>
        tpu.vector_store %arg11[%c0_71, %c0_72], %147 {strides = array<i32>} : memref<2x32xf32, #tpu.memory_space<vmem>>, vector<2x32xf32>,
      } else {
      }
      %c0_32 = arith.constant 0 : index
      %c0_33 = arith.constant 0 : index
      %23 = vector.load %arg11[%c0_32, %c0_33] : memref<2x32xf32, #tpu.memory_space<vmem>>, vector<2x32xf32>
      %cst_34 = arith.constant dense<0.000000e+00> : vector<2x192xf32>
      %24 = tpu.matmul %19, %8, %cst_34 {dimension_numbers = #tpu.dot_dimension_numbers<[1], [0], [0], [1], [0, 0, 1, 1], [], []>} : vector<2x32xf32>, vector<32x192xf32>, vector<2x192xf32> -> vector<2x192xf32>
      %25 = vector.broadcast %9 : vector<1x192xf32> to vector<2x192xf32>
      %26 = arith.addf %24, %25 : vector<2x192xf32>
      %cst_35 = arith.constant dense<0.000000e+00> : vector<2x192xf32>
      %27 = tpu.matmul %23, %10, %cst_35 {dimension_numbers = #tpu.dot_dimension_numbers<[1], [0], [0], [1], [0, 0, 1, 1], [], []>} : vector<2x32xf32>, vector<32x192xf32>, vector<2x192xf32> -> vector<2x192xf32>
      %28 = vector.broadcast %11 : vector<1x192xf32> to vector<2x192xf32>
      %29 = arith.addf %27, %28 : vector<2x192xf32>
      %30 = vector.extract_strided_slice %26 {offsets = [0, 0], sizes = [2, 96], strides = [1, 1]} : vector<2x192xf32> to vector<2x96xf32>
      %31 = vector.extract_strided_slice %29 {offsets = [0, 0], sizes = [2, 96], strides = [1, 1]} : vector<2x192xf32> to vector<2x96xf32>
      %32 = vector.extract_strided_slice %30 {offsets = [0, 0], sizes = [2, 32], strides = [1, 1]} : vector<2x96xf32> to vector<2x32xf32>
      %33 = vector.extract_strided_slice %31 {offsets = [0, 0], sizes = [2, 32], strides = [1, 1]} : vector<2x96xf32> to vector<2x32xf32>
      %34 = arith.addf %32, %33 : vector<2x32xf32>
      %35 = arith.negf %34 : vector<2x32xf32>
      %36 = math.exp %35 : vector<2x32xf32>
      %cst_36 = arith.constant 1.000000e+00 : f32
      %37 = vector.broadcast %cst_36 : f32 to vector<2x32xf32>
      %38 = arith.addf %37, %36 : vector<2x32xf32>
      %39 = arith.divf %37, %38 : vector<2x32xf32>
      %40 = vector.extract_strided_slice %30 {offsets = [0, 32], sizes = [2, 32], strides = [1, 1]} : vector<2x96xf32> to vector<2x32xf32>
      %41 = vector.extract_strided_slice %31 {offsets = [0, 32], sizes = [2, 32], strides = [1, 1]} : vector<2x96xf32> to vector<2x32xf32>
      %42 = arith.addf %40, %41 : vector<2x32xf32>
      %43 = arith.negf %42 : vector<2x32xf32>
      %44 = math.exp %43 : vector<2x32xf32>
      %cst_37 = arith.constant 1.000000e+00 : f32
      %45 = vector.broadcast %cst_37 : f32 to vector<2x32xf32>
      %46 = arith.addf %45, %44 : vector<2x32xf32>
      %47 = arith.divf %45, %46 : vector<2x32xf32>
      %48 = vector.extract_strided_slice %30 {offsets = [0, 64], sizes = [2, 32], strides = [1, 1]} : vector<2x96xf32> to vector<2x32xf32>
      %49 = vector.extract_strided_slice %31 {offsets = [0, 64], sizes = [2, 32], strides = [1, 1]} : vector<2x96xf32> to vector<2x32xf32>
      %50 = arith.mulf %39, %49 : vector<2x32xf32>
      %51 = arith.addf %48, %50 : vector<2x32xf32>
      %52 = math.tanh %51 : vector<2x32xf32>
      %53 = arith.subf %23, %52 : vector<2x32xf32>
      %54 = arith.mulf %47, %53 : vector<2x32xf32>
      %55 = arith.addf %52, %54 : vector<2x32xf32>
      %56 = vector.extract_strided_slice %29 {offsets = [0, 96], sizes = [2, 96], strides = [1, 1]} : vector<2x192xf32> to vector<2x96xf32>
      %57 = vector.extract_strided_slice %26 {offsets = [0, 96], sizes = [2, 96], strides = [1, 1]} : vector<2x192xf32> to vector<2x96xf32>
      %58 = vector.extract_strided_slice %56 {offsets = [0, 0], sizes = [2, 32], strides = [1, 1]} : vector<2x96xf32> to vector<2x32xf32>
      %59 = vector.extract_strided_slice %57 {offsets = [0, 0], sizes = [2, 32], strides = [1, 1]} : vector<2x96xf32> to vector<2x32xf32>
      %60 = arith.addf %58, %59 : vector<2x32xf32>
      %61 = arith.negf %60 : vector<2x32xf32>
      %62 = math.exp %61 : vector<2x32xf32>
      %cst_38 = arith.constant 1.000000e+00 : f32
      %63 = vector.broadcast %cst_38 : f32 to vector<2x32xf32>
      %64 = arith.addf %63, %62 : vector<2x32xf32>
      %65 = arith.divf %63, %64 : vector<2x32xf32>
      %66 = vector.extract_strided_slice %56 {offsets = [0, 32], sizes = [2, 32], strides = [1, 1]} : vector<2x96xf32> to vector<2x32xf32>
      %67 = vector.extract_strided_slice %57 {offsets = [0, 32], sizes = [2, 32], strides = [1, 1]} : vector<2x96xf32> to vector<2x32xf32>
      %68 = arith.addf %66, %67 : vector<2x32xf32>
      %69 = arith.negf %68 : vector<2x32xf32>
      %70 = math.exp %69 : vector<2x32xf32>
      %cst_39 = arith.constant 1.000000e+00 : f32
      %71 = vector.broadcast %cst_39 : f32 to vector<2x32xf32>
      %72 = arith.addf %71, %70 : vector<2x32xf32>
      %73 = arith.divf %71, %72 : vector<2x32xf32>
      %74 = vector.extract_strided_slice %56 {offsets = [0, 64], sizes = [2, 32], strides = [1, 1]} : vector<2x96xf32> to vector<2x32xf32>
      %75 = vector.extract_strided_slice %57 {offsets = [0, 64], sizes = [2, 32], strides = [1, 1]} : vector<2x96xf32> to vector<2x32xf32>
      %76 = arith.mulf %65, %75 : vector<2x32xf32>
      %77 = arith.addf %74, %76 : vector<2x32xf32>
      %78 = math.tanh %77 : vector<2x32xf32>
      %79 = arith.subf %19, %78 : vector<2x32xf32>
      %80 = arith.mulf %73, %79 : vector<2x32xf32>
      %81 = arith.addf %78, %80 : vector<2x32xf32>
      %82 = arith.addf %55, %81 : vector<2x32xf32>
      %83 = arith.index_cast %16 : i32 to index
      %c0_40 = arith.constant 0 : index
      %c0_41 = arith.constant 0 : index
      %84 = vector.load %arg10[%83, %c0_40, %c0_41] : memref<8x2x32xf32, #tpu.memory_space<vmem>>, vector<1x2x32xf32>
      %85 = vector.shape_cast %84 : vector<1x2x32xf32> to vector<2x32xf32>
      %86 = vector.shape_cast %82 : vector<2x32xf32> to vector<1x2x32xf32>
      tpu.vector_store %arg10[%83, %c0_40, %c0_41], %86 {strides = array<i32>} : memref<8x2x32xf32, #tpu.memory_space<vmem>>, vector<1x2x32xf32>,
      %cst_42 = arith.constant dense<0.000000e+00> : vector<2x64xf32>
      %87 = tpu.matmul %82, %12, %cst_42 {dimension_numbers = #tpu.dot_dimension_numbers<[1], [0], [0], [1], [0, 0, 1, 1], [], []>} : vector<2x32xf32>, vector<32x64xf32>, vector<2x64xf32> -> vector<2x64xf32>
      %88 = vector.extract_strided_slice %87 {offsets = [0, 0], sizes = [2, 32], strides = [1, 1]} : vector<2x64xf32> to vector<2x32xf32>
      %89 = arith.index_cast %16 : i32 to index
      %c0_43 = arith.constant 0 : index
      %c0_44 = arith.constant 0 : index
      %90 = vector.load %arg12[%89, %c0_43, %c0_44] : memref<8x2x32xf32, #tpu.memory_space<vmem>>, vector<1x2x32xf32>
      %91 = vector.shape_cast %90 : vector<1x2x32xf32> to vector<2x32xf32>
      %92 = vector.shape_cast %88 : vector<2x32xf32> to vector<1x2x32xf32>
      tpu.vector_store %arg12[%89, %c0_43, %c0_44], %92 {strides = array<i32>} : memref<8x2x32xf32, #tpu.memory_space<vmem>>, vector<1x2x32xf32>,
      %93 = vector.extract_strided_slice %87 {offsets = [0, 32], sizes = [2, 32], strides = [1, 1]} : vector<2x64xf32> to vector<2x32xf32>
      %94 = arith.index_cast %16 : i32 to index
      %c0_45 = arith.constant 0 : index
      %c0_46 = arith.constant 0 : index
      %95 = vector.load %arg13[%94, %c0_45, %c0_46] : memref<8x2x32xf32, #tpu.memory_space<vmem>>, vector<1x2x32xf32>
      %96 = vector.shape_cast %95 : vector<1x2x32xf32> to vector<2x32xf32>
      %97 = vector.shape_cast %93 : vector<2x32xf32> to vector<1x2x32xf32>
      tpu.vector_store %arg13[%94, %c0_45, %c0_46], %97 {strides = array<i32>} : memref<8x2x32xf32, #tpu.memory_space<vmem>>, vector<1x2x32xf32>,
      %98 = vector.broadcast %13 : vector<1x32xf32> to vector<2x32xf32>
      %99 = arith.mulf %82, %98 : vector<2x32xf32>
      %cst_47 = arith.constant dense<0.000000e+00> : vector<2xf32>
      %100 = vector.multi_reduction <add>, %99, %cst_47 [1] : vector<2x32xf32> to vector<2xf32>
      %101 = vector.shape_cast %100 : vector<2xf32> to vector<2x1xf32>
      %102 = arith.index_cast %16 : i32 to index
      %c0_48 = arith.constant 0 : index
      %c0_49 = arith.constant 0 : index
      %103 = vector.load %arg14[%102, %c0_48, %c0_49] : memref<8x2x1xf32, #tpu.memory_space<vmem>>, vector<1x2x1xf32>
      %104 = vector.shape_cast %103 : vector<1x2x1xf32> to vector<2x1xf32>
      %105 = vector.shape_cast %101 : vector<2x1xf32> to vector<1x2x1xf32>
      tpu.vector_store %arg14[%102, %c0_48, %c0_49], %105 {strides = array<i32>} : memref<8x2x1xf32, #tpu.memory_space<vmem>>, vector<1x2x1xf32>,
    }
    %c8_i32_25 = arith.constant 8 : i32
    return
  }
}

</mosaic_0001>

<bundles_post_ra>
// kernel: grn_forward.1
= control target key start
LH: loop header
LB: loop body
LE: loop exit
PB: predicated region body
PF: predicated region fallthrough
CT: control target
= control target key end

     0   :  { %vm35_vm0 = vcmask 254976   ;;  %vm53_vm1 = vcmask 1024   ;;  %v921_v0 = vmov 0.0   ;;  %s1124_s15 = smov 0   ;;  %s1276_s0 = inlined_call_operand.vmem [shape: f32[8,2,32], index: 0, kind: input, shape index: {}]   ;;  %s1277_s1 = inlined_call_operand.vmem [shape: f32[8,8,2], index: 1, kind: input, shape index: {}]   ;;  %s1278_s2 = inlined_call_operand.vmem [shape: f32[8,8,2], index: 2, kind: input, shape index: {}]   ;;  %s1279_s3 = inlined_call_operand.vmem [shape: f32[8,8,2], index: 3, kind: input, shape index: {}]   ;;  %s1280_s4 = inlined_call_operand.vmem [shape: f32[32,192], index: 4, kind: input, shape index: {}]   ;;  %s1281_s5 = inlined_call_operand.vmem [shape: f32[1,192], index: 5, kind: input, shape index: {}]   ;;  %s1282_s10 = inlined_call_operand.vmem [shape: f32[8,2,32], index: 10, kind: output, shape index: {}]   ;;  %s1283_s6 = inlined_call_operand.vmem [shape: f32[32,192], index: 6, kind: input, shape index: {}]   ;;  %s1284_s7 = inlined_call_operand.vmem [shape: f32[1,192], index: 7, kind: input, shape index: {}]   ;;  %s1285_s8 = inlined_call_operand.vmem [shape: f32[32,64], index: 8, kind: input, shape index: {}]   ;;  %s1286_s9 = inlined_call_operand.vmem [shape: f32[1,32], index: 9, kind: input, shape index: {}]  }
   0x1   :  { %36 = vst.msk [vmem:[#allocation2] sm:$0x3] %vm35_vm0, %v921_v0  ;;  %37 = vst.msk [vmem:[#allocation3] sm:$0x3] %vm35_vm0, %v921_v0  ;;  %v1004_v1 = vld [vmem:[%s1280_s4] sm:$0xff]  ;;  %v1009_v2 = vld [vmem:[%s1280_s4 + $0x8] sm:$0xff] }
   0x2   :  { %38 = vst.msk [vmem:[#allocation3 + $0x2] sm:$0x3] %vm35_vm0, %v921_v0  ;;  %39 = vst.msk [vmem:[#allocation3 + $0x4] sm:$0x3] %vm35_vm0, %v921_v0  ;;  %v1014_v3 = vld [vmem:[%s1280_s4 + $0x10] sm:$0xff]  ;;  %v1027_v4 = vld [vmem:[%s1280_s4 + $0x18] sm:$0xff] }
   0x3   :  { %40 = vst.msk [vmem:[#allocation3 + $0x6] sm:$0x3] %vm35_vm0, %v921_v0  ;;  %41 = vst.msk [vmem:[#allocation3 + $0x8] sm:$0x3] %vm35_vm0, %v921_v0  ;;  %v1032_v5 = vld [vmem:[%s1280_s4 + $0x20] sm:$0xff]  ;;  %v1037_v6 = vld [vmem:[%s1280_s4 + $0x28] sm:$0xff] }
   0x4   :  { %42 = vst.msk [vmem:[#allocation3 + $0xa] sm:$0x3] %vm35_vm0, %v921_v0  ;;  %43 = vst.msk [vmem:[#allocation3 + $0xc] sm:$0x3] %vm35_vm0, %v921_v0  ;;  %v1042_v7 = vld [vmem:[%s1280_s4 + $0x30] sm:$0xff]  ;;  %v1047_v8 = vld [vmem:[%s1280_s4 + $0x38] sm:$0xff] }
   0x5   :  { %44 = vst.msk [vmem:[#allocation3 + $0xe] sm:$0x3] %vm35_vm0, %v921_v0  ;;  %45 = vst.msk [vmem:[#allocation4] sm:$0x3] %vm35_vm0, %v921_v0  ;;  %v1052_v9 = vld [vmem:[%s1281_s5] sm:$0x3] }
   0x6   :  { %46 = vst.msk [vmem:[#allocation4 + $0x2] sm:$0x3] %vm35_vm0, %v921_v0  ;;  %47 = vst.msk [vmem:[#allocation4 + $0x4] sm:$0x3] %vm35_vm0, %v921_v0  ;;  %v1057_v10 = vld [vmem:[%s1283_s6] sm:$0xff]  ;;  %v1062_v11 = vld [vmem:[%s1283_s6 + $0x8] sm:$0xff] }
   0x7   :  { %48 = vst.msk [vmem:[#allocation4 + $0x6] sm:$0x3] %vm35_vm0, %v921_v0  ;;  %49 = vst.msk [vmem:[#allocation4 + $0x8] sm:$0x3] %vm35_vm0, %v921_v0  ;;  %v1067_v12 = vld [vmem:[%s1283_s6 + $0x10] sm:$0xff]  ;;  %v1072_v13 = vld [vmem:[%s1283_s6 + $0x18] sm:$0xff] }
   0x8   :  { %50 = vst.msk [vmem:[#allocation4 + $0xa] sm:$0x3] %vm35_vm0, %v921_v0  ;;  %51 = vst.msk [vmem:[#allocation4 + $0xc] sm:$0x3] %vm35_vm0, %v921_v0  ;;  %v1077_v14 = vld [vmem:[%s1283_s6 + $0x20] sm:$0xff]  ;;  %v1082_v15 = vld [vmem:[%s1283_s6 + $0x28] sm:$0xff] }
   0x9   :  { %52 = vst.msk [vmem:[#allocation4 + $0xe] sm:$0x3] %vm35_vm0, %v921_v0  ;;  %v1087_v16 = vld [vmem:[%s1283_s6 + $0x30] sm:$0xff]  ;;  %v1092_v17 = vld [vmem:[%s1283_s6 + $0x38] sm:$0xff]  ;;  %v1097_v18 = vld [vmem:[%s1284_s7] sm:$0x3] }
   0xa   :  { %54 = vst.msk [vmem:[#allocation5] sm:$0x3] %vm53_vm1, %v921_v0  ;;  %55 = vst.msk [vmem:[#allocation5 + $0x2] sm:$0x3] %vm53_vm1, %v921_v0  ;;  %v1102_v19 = vld [vmem:[%s1285_s8] sm:$0xff]  ;;  %v1107_v20 = vld [vmem:[%s1285_s8 + $0x8] sm:$0xff] }
   0xb   :  { %56 = vst.msk [vmem:[#allocation5 + $0x4] sm:$0x3] %vm53_vm1, %v921_v0  ;;  %57 = vst.msk [vmem:[#allocation5 + $0x6] sm:$0x3] %vm53_vm1, %v921_v0  ;;  %v1112_v21 = vld [vmem:[%s1285_s8 + $0x10] sm:$0xff]  ;;  %v1117_v22 = vld [vmem:[%s1285_s8 + $0x18] sm:$0xff] }
   0xc   :  { %58 = vst.msk [vmem:[#allocation5 + $0x8] sm:$0x3] %vm53_vm1, %v921_v0  ;;  %59 = vst.msk [vmem:[#allocation5 + $0xa] sm:$0x3] %vm53_vm1, %v921_v0  ;;  %v1122_v23 = vld [vmem:[%s1286_s9] ss:$0 sm:$0xff] }
   0xd   :  { %60 = vst.msk [vmem:[#allocation5 + $0xc] sm:$0x3] %vm53_vm1, %v921_v0  ;;  %61 = vst.msk [vmem:[#allocation5 + $0xe] sm:$0x3] %vm53_vm1, %v921_v0 }
   0xe LB: > { %s1130_s16 = sshll.u32 %s919_s15, 1  ;;  %p833_p0 = scmp.le.s32.totalorder %s919_s15, 0  ;;  %s919_s15 = sphi %s1124_s15, %s90_s15  }
   0xf   : > { %s92_s8 = scalar_lea.vmem %s1276_s0, %s1130_s16  ;;  %s1140_s9 = sshll.u32 (!%p833_p0), %s919_s15, 3  ;;  %v112_v25 = vlaneseq (!%p833_p0)  ;;  %v922_v26 = vmov (!%p833_p0), 0   ;;  %vm254_vm2 = vcmask (!%p833_p0), 1041409   ;;  %vm256_vm3 = vcmask (!%p833_p0), 1042434  }
  0x10   : > { %v1136_v24 = vld [vmem:[%s92_s8] sm:$0x3]  ;;  %97 = sbr.rel (%p833_p0) target bundleno = 499 (0x1f3), region = 52  ;;  %s107_s19 = scalar_lea.vmem (!%p833_p0), %s1277_s1, %s1140_s9  ;;  %895 = vset.pattern.permute.xlu0 (!%p833_p0), %v922_v26  ;;  %896 = vset.pattern.permute.xlu1 (!%p833_p0), %v922_v26  ;;  %vm258_vm4 = vcmask (!%p833_p0), 1043459   ;;  %vm260_vm5 = vcmask (!%p833_p0), 1044484   ;;  %vm262_vm6 = vcmask (!%p833_p0), 1045509  }
  0x11   : > { %v108_v27 = vld [vmem:[%s107_s19] sm:$0xff] (!%p833_p0)  ;;  %v1147_v28 = vshrl.u32 (!%p833_p0), %v112_v25, 7  ;;  %vm264_vm7 = vcmask (!%p833_p0), 1046534   ;;  %vm266_vm8 = vcmask (!%p833_p0), 1047559   ;;  %vm270_vm10 = vcmask (!%p833_p0), 15360   ;;  %s290_s22 = scalar_lea.vmem (!%p833_p0), %s1278_s2, %s1140_s9  ;;  %s349_s25 = scalar_lea.vmem (!%p833_p0), %s1279_s3, %s1140_s9 }
  0x12   : > { %v109_v29 = vsub.f32 (!%p833_p0), 1.0, %v108_v27  ;;  %v98_v47 = vld [vmem:[#allocation5] sm:$0x3] (!%p833_p0)  ;;  %v101_v51 = vld [vmem:[#allocation5 + $0x6] sm:$0x3] (!%p833_p0) }
  0x13   : > { %v1150_v30 = vsub.s32 (!%p833_p0), 2, %v1147_v28  ;;  %v1153_v31 = vsub.s32 (!%p833_p0), 0, %v1147_v28  ;;  %v1156_v33 = vsub.s32 (!%p833_p0), 3, %v1147_v28  ;;  %v1159_v34 = vsub.s32 (!%p833_p0), 1, %v1147_v28  ;;  %v99_v52 = vld [vmem:[#allocation5 + $0x2] sm:$0x3] (!%p833_p0) }
  0x14   : > { %v110_v32 = vmul.f32 (!%p833_p0), 1e+30, %v109_v29  ;;  %v1166_v39 = vsub.s32 (!%p833_p0), 5, %v1147_v28  ;;  %v1169_v40 = vsub.s32 (!%p833_p0), 4, %v1147_v28  ;;  %v1173_v42 = vsub.s32 (!%p833_p0), 7, %v1147_v28 }
  0x15   : > { %v1177_v44 = vsub.s32 (!%p833_p0), 6, %v1147_v28  ;;  %v100_v57 = vld [vmem:[#allocation5 + $0x4] sm:$0x3] (!%p833_p0)  ;;  %v103_v58 = vld [vmem:[#allocation5 + $0xa] sm:$0x3] (!%p833_p0) }
  0x16   : > { %v129_v35 = vrot.slane (!%p833_p0), %v110_v32, %v1150_v30  ;;  %v115_v36 = vrot.slane (!%p833_p0), %v110_v32, %v1153_v31  ;;  %v136_v37 = vrot.slane (!%p833_p0), %v110_v32, %v1156_v33  ;;  %v122_v38 = vrot.slane (!%p833_p0), %v110_v32, %v1159_v34  ;;  %v102_v61 = vld [vmem:[#allocation5 + $0x8] sm:$0x3] (!%p833_p0)  ;;  %v105_v0 = vld [vmem:[#allocation5 + $0xe] sm:$0x3] (!%p833_p0) }
  0x17   : > { %v150_v41 = vrot.slane %v110_v32, %v1166_v39  ;;  %v143_v43 = vrot.slane %v110_v32, %v1169_v40  ;;  %v164_v45 = vrot.slane %v110_v32, %v1173_v42  ;;  %v157_v46 = vrot.slane %v110_v32, %v1177_v44  ;;  %v104_v32 = vld [vmem:[#allocation5 + $0xc] sm:$0x3] }
  0x18   : > { %131 = vbcast.lane.b32.xlu1 %v129_v35, 256  ;;  %117 = vbcast.lane.b32.xlu0 %v115_v36, 256 }
  0x1c   : > { %138 = vbcast.lane.b32.xlu1 %v136_v37, 256  ;;  %124 = vbcast.lane.b32.xlu0 %v122_v38, 256  ;;  %v221_v37 = vand.u32 127, %v112_v25 }
  0x20   : > { %152 = vbcast.lane.b32.xlu1 %v150_v41, 256  ;;  %145 = vbcast.lane.b32.xlu0 %v143_v43, 256  ;;  %v224_v41 = vsub.s32 %v221_v37, %v1147_v28 }
  0x24   : > { %166 = vbcast.lane.b32.xlu1 %v164_v45, 256  ;;  %159 = vbcast.lane.b32.xlu0 %v157_v46, 256 }
  0x8a   : > { %v132_v48 = vpop.permute.xlu1 %131  ;;  %v118_v49 = vpop.permute.xlu0 %117 }
  0x8b   : > { %v176_v50 = vsub.f32 %v98_v47, %v118_v49  ;;  %v178_v62 = vsub.f32 %v100_v57, %v132_v48 }
  0x8d   : > { %197 = vperm.xlu0 %895, %v176_v50  }
  0x8e   : > { %v139_v53 = vpop.permute.xlu1 %138  ;;  %v125_v54 = vpop.permute.xlu0 %124 }
  0x8f   : > { %v179_v55 = vsub.f32 %v101_v51, %v139_v53  ;;  %v177_v56 = vsub.f32 %v99_v52, %v125_v54 }
  0x91   : > { %200 = vperm.xlu1 %896, %v177_v56   ;;  %206 = vperm.xlu0 %895, %v179_v55  }
  0x92   : > { %v153_v59 = vpop.permute.xlu1 %152  ;;  %v146_v60 = vpop.permute.xlu0 %145 }
  0x93   : > { %v181_v63 = vsub.f32 %v103_v58, %v153_v59  ;;  %v180_v26 = vsub.f32 %v102_v61, %v146_v60  ;;  %v186_v58 = vstv %s919_s15 }
  0x94   : > { %vm187_vm9 = vcmp.lt.s32.totalorder %v1147_v28, %v186_v58 }
  0x95   : > { %203 = vperm.xlu1 %896, %v178_v62   ;;  %212 = vperm.xlu0 %895, %v181_v63  }
  0x96   : > { %v167_v27 = vpop.permute.xlu1 %166  ;;  %v160_v29 = vpop.permute.xlu0 %159 }
  0x97   : > { %v183_v35 = vsub.f32 %v105_v0, %v167_v27  ;;  %v182_v36 = vsub.f32 %v104_v32, %v160_v29 }
  0x99   : > { %209 = vperm.xlu1 %896, %v180_v26   ;;  %218 = vperm.xlu0 %895, %v183_v35  }
  0x9d   : > { %215 = vperm.xlu1 %896, %v182_v36  }
 0x10c   : > { %v198_v38 = vpop.permute.xlu0 %197 }
 0x10d   : > { %v225_v47 = vrot.slane %v198_v38, %v224_v41 }
 0x110   : > { %v201_v43 = vpop.permute.xlu1 %200  ;;  %v207_v45 = vpop.permute.xlu0 %206 }
 0x111   : > { %v229_v46 = vrot.slane %v201_v43, %v224_v41  ;;  %v237_v53 = vrot.slane %v207_v45, %v224_v41 }
 0x113   : > { %v255_v51 = vsel %vm254_vm2, %v229_v46, %v225_v47 }
 0x114   : > { %v204_v48 = vpop.permute.xlu1 %203  ;;  %v213_v50 = vpop.permute.xlu0 %212 }
 0x115   : > { %v233_v49 = vrot.slane %v204_v48, %v224_v41  ;;  %v245_v59 = vrot.slane %v213_v50, %v224_v41 }
 0x117   : > { %v257_v52 = vsel %vm256_vm3, %v233_v49, %v255_v51 }
 0x118   : > { %v210_v54 = vpop.permute.xlu1 %209  ;;  %v259_v55 = vsel %vm258_vm4, %v237_v53, %v257_v52  ;;  %v219_v57 = vpop.permute.xlu0 %218 }
 0x119   : > { %v241_v25 = vrot.slane %v210_v54, %v224_v41  ;;  %v253_v62 = vrot.slane %v219_v57, %v224_v41  ;;  %v291_v54 = vld [vmem:[%s290_s22] sm:$0xff] }
 0x11b   : > { %v261_v56 = vsel %vm260_vm5, %v241_v25, %v259_v55  ;;  %v350_v55 = vld [vmem:[%s349_s25] sm:$0xff] }
 0x11c   : > { %v216_v60 = vpop.permute.xlu1 %215  ;;  %v263_v63 = vsel %vm262_vm6, %v245_v59, %v261_v56 }
 0x11d   : > { %v249_v61 = vrot.slane %v216_v60, %v224_v41 }
 0x11f   : > { %v265_v0 = vsel %vm264_vm7, %v249_v61, %v263_v63 }
 0x120   : > { %v267_v26 = vsel %vm266_vm8, %v253_v62, %v265_v0 }
 0x121   : > { %v269_v27 = vsel %vm187_vm9, %v267_v26, -inf }
 0x122   : > { %v271_v29 = vsel %vm270_vm10, %v269_v27, -inf }
 0x123   : > { %v272_v32 = vrot.slane %v271_v29, 4 }
 0x125   : > { %v273_v35 = vmax.f32 %v271_v29, %v272_v32 }
 0x127   : > { %v274_v36 = vrot.slane %v273_v35, 2 }
 0x129   : > { %v275_v37 = vmax.f32 %v273_v35, %v274_v36 }
 0x12b   : > { %v276_v38 = vrot.slane %v275_v37, 1 }
 0x12d   : > { %v277_v43 = vmax.f32 %v275_v37, %v276_v38 }
 0x12f   : > { %v278_v45 = vsub.f32 %v269_v27, %v277_v43  ;;  %v425_v43 = vld [vmem:[#allocation4 + $0x2] sm:$0x3] }
 0x131   : > { %v279_v46 = vmul.f32 1.442695, %v278_v45 }
 0x133   : > { %897 = vpow2.f32 %v279_v46 }
 0x13d   : > { %v898_v41 = vpop.eup %897 }
 0x13e   : > { %v281_v47 = vsel %vm270_vm10, %v898_v41, 0.0 }
 0x13f   : > { %v282_v28 = vrot.slane %v281_v47, 4 }
 0x141   : > { %v283_v48 = vadd.f32 %v282_v28, %v281_v47  ;;  %v408_v47 = vld [vmem:[#allocation3] sm:$0x3]  ;;  %v426_v28 = vld [vmem:[#allocation4 + $0x4] sm:$0x3] }
 0x143   : > { %v284_v49 = vrot.slane %v283_v48, 2 }
 0x145   : > { %v285_v50 = vadd.f32 %v284_v49, %v283_v48 }
 0x147   : > { %v286_v51 = vrot.slane %v285_v50, 1 }
 0x149   : > { %v287_v52 = vadd.f32 %v286_v51, %v285_v50  ;;  %v427_v50 = vld [vmem:[#allocation4 + $0x6] sm:$0x3] }
 0x14b   : > { %899 = vrcp.f32 %v287_v52  ;;  %v411_v52 = vld [vmem:[#allocation3 + $0x6] sm:$0x3] }
 0x155   : > { %v900_v53 = vpop.eup %899 }
 0x156   : > { %v289_v25 = vmul.f32 %v900_v53, %v898_v41  ;;  %v409_v41 = vld [vmem:[#allocation3 + $0x2] sm:$0x3] }
 0x158   : > { %v292_v56 = vmul.f32 %v291_v54, %v289_v25  ;;  %v351_v57 = vmul.f32 %v350_v55, %v289_v25 }
 0x15a   : > { %v303_v58 = vrot.slane %v292_v56, %v1159_v34  ;;  %v296_v59 = vrot.slane %v292_v56, %v1153_v31  ;;  %v362_v60 = vrot.slane %v351_v57, %v1159_v34  ;;  %v355_v61 = vrot.slane %v351_v57, %v1153_v31 }
 0x15b   : > { %v369_v62 = vrot.slane %v351_v57, %v1150_v30  ;;  %v310_v63 = vrot.slane %v292_v56, %v1150_v30  ;;  %v376_v0 = vrot.slane %v351_v57, %v1156_v33  ;;  %v317_v26 = vrot.slane %v292_v56, %v1156_v33 }
 0x15c   : > { %305 = vbcast.lane.b32.xlu0 %v303_v58, 256  ;;  %298 = vbcast.lane.b32.xlu1 %v296_v59, 256  ;;  %v383_v27 = vrot.slane %v351_v57, %v1169_v40  ;;  %v324_v34 = vrot.slane %v292_v56, %v1169_v40  ;;  %v390_v31 = vrot.slane %v351_v57, %v1166_v39 }
 0x15d   : > { %v331_v29 = vrot.slane %v292_v56, %v1166_v39  ;;  %v397_v30 = vrot.slane %v351_v57, %v1177_v44  ;;  %v338_v32 = vrot.slane %v292_v56, %v1177_v44  ;;  %v404_v33 = vrot.slane %v351_v57, %v1173_v42  ;;  %v424_v39 = vld [vmem:[#allocation4] sm:$0x3]  ;;  %v410_v44 = vld [vmem:[#allocation3 + $0x4] sm:$0x3]  ;;  %v412_v57 = vld [vmem:[#allocation3 + $0x8] sm:$0x3] }
 0x15e   : > { %v345_v35 = vrot.slane %v292_v56, %v1173_v42  ;;  %v428_v56 = vld [vmem:[#allocation4 + $0x8] sm:$0x3] }
 0x160   : > { %364 = vbcast.lane.b32.xlu0 %v362_v60, 256  ;;  %357 = vbcast.lane.b32.xlu1 %v355_v61, 256 }
 0x164   : > { %371 = vbcast.lane.b32.xlu0 %v369_v62, 256  ;;  %312 = vbcast.lane.b32.xlu1 %v310_v63, 256 }
 0x168   : > { %378 = vbcast.lane.b32.xlu0 %v376_v0, 256  ;;  %319 = vbcast.lane.b32.xlu1 %v317_v26, 256 }
 0x16c   : > { %385 = vbcast.lane.b32.xlu0 %v383_v27, 256  ;;  %326 = vbcast.lane.b32.xlu1 %v324_v34, 256  ;;  %v429_v34 = vld [vmem:[#allocation4 + $0xa] sm:$0x3] }
 0x170   : > { %392 = vbcast.lane.b32.xlu0 %v390_v31, 256  ;;  %333 = vbcast.lane.b32.xlu1 %v331_v29, 256  ;;  %v413_v31 = vld [vmem:[#allocation3 + $0xa] sm:$0x3] }
 0x174   : > { %399 = vbcast.lane.b32.xlu0 %v397_v30, 256  ;;  %340 = vbcast.lane.b32.xlu1 %v338_v32, 256 }
 0x178   : > { %406 = vbcast.lane.b32.xlu0 %v404_v33, 256  ;;  %347 = vbcast.lane.b32.xlu1 %v345_v35, 256 }
 0x1ce   : > { %v306_v40 = vpop.permute.xlu0 %305  ;;  %v299_v36 = vpop.permute.xlu1 %298 }
 0x1cf   : > { %v417_v53 = vmul.f32 %v409_v41, %v306_v40  ;;  %v416_v54 = vmul.f32 %v408_v47, %v299_v36 }
 0x1d2   : > { %v365_v37 = vpop.permute.xlu0 %364  ;;  %v358_v38 = vpop.permute.xlu1 %357 }
 0x1d3   : > { %v433_v48 = vmul.f32 %v425_v43, %v365_v37  ;;  %v432_v49 = vmul.f32 %v424_v39, %v358_v38  ;;  %v430_v39 = vld [vmem:[#allocation4 + $0xc] sm:$0x3] }
 0x1d5   : > { %v441_v58 = vadd.f32 %v433_v48, %v417_v53  ;;  %v440_v59 = vadd.f32 %v432_v49, %v416_v54 }
 0x1d6   : > { %v372_v45 = vpop.permute.xlu0 %371  ;;  %v313_v46 = vpop.permute.xlu1 %312 }
 0x1d7   : > { %v434_v25 = vmul.f32 %v426_v28, %v372_v45  ;;  %v418_v55 = vmul.f32 %v410_v44, %v313_v46  ;;  %v449_v29 = vsel %vm35_vm0, %v441_v58, 0.0  ;;  %v448_v30 = vsel %vm35_vm0, %v440_v59, 0.0  ;;  %v414_v45 = vld [vmem:[#allocation3 + $0xc] sm:$0x3] }
 0x1d8   : > { %v450_v43 = vadd.f32 %v449_v29, %v448_v30 }
 0x1d9   : > { %v442_v0 = vadd.f32 %v434_v25, %v418_v55 }
 0x1da   : > { %v379_v51 = vpop.permute.xlu0 %378  ;;  %v320_v42 = vpop.permute.xlu1 %319 }
 0x1db   : > { %v435_v60 = vmul.f32 %v427_v50, %v379_v51  ;;  %v419_v61 = vmul.f32 %v411_v52, %v320_v42  ;;  %v451_v40 = vsel %vm35_vm0, %v442_v0, 0.0  ;;  %v431_v52 = vld [vmem:[#allocation4 + $0xe] sm:$0x3]  ;;  %v415_v42 = vld [vmem:[#allocation3 + $0xe] sm:$0x3] }
 0x1dc   : > { %v452_v47 = vadd.f32 %v451_v40, %v450_v43 }
 0x1dd   : > { %v443_v32 = vadd.f32 %v435_v60, %v419_v61 }
 0x1de   : > { %v386_v62 = vpop.permute.xlu0 %385  ;;  %v327_v63 = vpop.permute.xlu1 %326 }
 0x1df   : > { %v436_v26 = vmul.f32 %v428_v56, %v386_v62  ;;  %v420_v27 = vmul.f32 %v412_v57, %v327_v63  ;;  %v453_v46 = vsel %vm35_vm0, %v443_v32, 0.0 }
 0x1e0   : > { %v454_v51 = vadd.f32 %v453_v46, %v452_v47 }
 0x1e1   : > { %v444_v36 = vadd.f32 %v436_v26, %v420_v27 }
 0x1e2   : > { %v393_v33 = vpop.permute.xlu0 %392  ;;  %v334_v35 = vpop.permute.xlu1 %333 }
 0x1e3   : > { %v437_v37 = vmul.f32 %v429_v34, %v393_v33  ;;  %v421_v38 = vmul.f32 %v413_v31, %v334_v35  ;;  %v455_v48 = vsel %vm35_vm0, %v444_v36, 0.0 }
 0x1e4   : > { %v456_v25 = vadd.f32 %v455_v48, %v454_v51 }
 0x1e5   : > { %v445_v41 = vadd.f32 %v437_v37, %v421_v38 }
 0x1e6   : > { %v400_v28 = vpop.permute.xlu0 %399  ;;  %v341_v44 = vpop.permute.xlu1 %340 }
 0x1e7   : > { %v438_v49 = vmul.f32 %v430_v39, %v400_v28  ;;  %v422_v50 = vmul.f32 %v414_v45, %v341_v44  ;;  %v457_v53 = vsel %vm35_vm0, %v445_v41, 0.0 }
 0x1e8   : > { %v458_v60 = vadd.f32 %v457_v53, %v456_v25 }
 0x1e9   : > { %v446_v54 = vadd.f32 %v438_v49, %v422_v50 }
 0x1ea   : > { %v407_v55 = vpop.permute.xlu0 %406  ;;  %v348_v56 = vpop.permute.xlu1 %347 }
 0x1eb   : > { %v459_v57 = vsel %vm35_vm0, %v446_v54, 0.0  ;;  %v439_v58 = vmul.f32 %v431_v52, %v407_v55  ;;  %v423_v59 = vmul.f32 %v415_v42, %v348_v56 }
 0x1ec   : > { %v460_v62 = vadd.f32 %v459_v57, %v458_v60 }
 0x1ed   : > { %v447_v61 = vadd.f32 %v439_v58, %v423_v59 }
 0x1ef   : > { %v461_v63 = vsel %vm35_vm0, %v447_v61, 0.0 }
 0x1f0   : > { %v462_v0 = vadd.f32 %v461_v63, %v460_v62 }
 0x1f2   : > { %463 = vst.msk [vmem:[#allocation2] sm:$0x3] %vm35_vm0, %v462_v0 }
 0x1f3 PF: > { %v857_v26 = vpack.c.bf16 %v1027_v4, %v1009_v2  ;;  %v865_v27 = vpack.c.bf16 %v1072_v13, %v1062_v11  ;;  %v859_v34 = vpack.c.bf16 %v1014_v3, %v1004_v1  ;;  %v867_v31 = vpack.c.bf16 %v1067_v12, %v1057_v10  ;;  %s924_s26 = smov 64   ;;  %s925_s27 = smov 96  }
 0x1f4   : > { %v861_v29 = vpack.c.bf16 %v1047_v8, %v1037_v6  ;;  %v869_v30 = vpack.c.bf16 %v1092_v17, %v1082_v15  ;;  %v863_v32 = vpack.c.bf16 %v1042_v7, %v1032_v5  ;;  %v871_v33 = vpack.c.bf16 %v1087_v16, %v1077_v14  ;;  %s926_s28 = smov 32   ;;  %s707_s11 = scalar_lea.vmem %s1282_s10, %s1130_s16 }
 0x1f5   : > { %858 = vmatprep.subr.bf16.mxu0 %v857_v26  ;;  %866 = vmatprep.subr.bf16.mxu1 %v865_v27  ;;  %v923_v35 = vmov 0.0   ;;  %vm476_vm11 = vcmask 261120   ;;  %v466_v36 = vlaneseq  ;;  %vm928_vm12 = vmmov 0   ;;  %s805_s12 = scalar_lea.vmem [#allocation5], %s1130_s16  ;;  %s781_s6 = scalar_lea.vmem [#allocation3], %s1130_s16 }
 0x1f6   : > { %860 = vmatpush1.bf16.msra.mxu0 %v859_v34  ;;  %868 = vmatpush1.bf16.msra.mxu1 %v867_v31  ;;  %s787_s13 = scalar_lea.vmem [#allocation4], %s1130_s16  ;;  %s90_s15 = sadd.s32 1, %s919_s15  }
 0x1f7   : > { %862 = vmatprep.subr.bf16.mxu0 %v861_v29  ;;  %870 = vmatprep.subr.bf16.mxu1 %v869_v30  ;;  %v467_v37 = vshrl.u32 %v466_v36, 7  ;;  %p87_p1 = scmp.ge.s32.totalorder %s90_s15, 8  }
 0x1f8   : > { %544 = vmatprep.mubr.f32.mxu0 %v923_v35  ;;  %629 = vmatprep.mubr.f32.mxu1 %v923_v35 }
 0x1f9   : > { %v464_v40 = vld [vmem:[#allocation2] sm:$0x3]  ;;  %v468_v38 = vsub.s32 0, %v467_v37  ;;  %v472_v43 = vsub.s32 1, %v467_v37 }
 0x1fa   : > { %864 = vmatpush1.bf16.msra.mxu0 %v863_v32  ;;  %872 = vmatpush1.bf16.msra.mxu1 %v871_v33 }
 0x1fb   : > { %v555_v39 = vrot.slane %v1097_v18, %v468_v38  ;;  %v559_v45 = vrot.slane %v1097_v18, %v472_v43  ;;  %v473_v28 = vrot.slane %v1052_v9, %v472_v43  ;;  %v469_v51 = vrot.slane %v1052_v9, %v468_v38 }
 0x1fd   : > { %835 = vmatmul.mubr.msk.f32.vlgmr.msra.gmra.mrb[0].mxu0 %vm476_vm11, %v1136_v24  ;;  %836 = vmatmul.mubr.msk.f32.vlgmr.msra.gmra.mrb[0].mxu1 %vm476_vm11, %v464_v40 }
 0x1fe   : > { %854 = vmatprep.mubr.msk.f32.mxu0 %vm928_vm12, %v923_v35 }
 0x2d0   : > { %v546_v46 = vpop.f32.mrb[0].mxu0  ;;  %v631_v41 = vpop.f32.mrb[0].mxu1 }
 0x2d1   : > { %v632_v47 = vadd.f32 %v631_v41, %v555_v39  ;;  %v548_v44 = vpop.f32.mrb[1].mxu0  ;;  %v633_v48 = vpop.f32.mrb[1].mxu1  ;;  %v547_v52 = vadd.f32 %v546_v46, %v469_v51  ;;  %v927_v46 = vmov 0.0|0.0  }
 0x2d2   : > { %v634_v49 = vadd.f32 %v633_v48, %v559_v45  ;;  %v549_v50 = vadd.f32 %v548_v44, %v473_v28  ;;  %v874_v45 = vpack.c.bf16 %v1107_v20, %v1102_v19  ;;  %873 = vmatprep.subr.bf16.mxu0 %v927_v46 }
 0x2d3   : > { %644 = vrot.lane.b32.xlu0 %v632_v47, %s924_s26  ;;  %v636_v42 = vadd.f32 %v632_v47, %v547_v52 }
 0x2d4   : > { %v669_v27 = vadd.f32 %v634_v49, %v549_v50  ;;  %875 = vmatpush3.bf16.msra.mxu0 %v874_v45 }
 0x2d5   : > { %v837_v53 = vmul.f32 -1.442695, %v636_v42  ;;  %876 = vmatprep.subr.bf16.mxu0 %v927_v46 }
 0x2d6   : > { %v838_v34 = vmul.f32 -1.442695, %v669_v27 }
 0x2d7   : > { %677 = vrot.lane.b32.xlu0 %v549_v50, %s924_s26  ;;  %901 = vpow2.f32 %v837_v53 }
 0x2e1   : > { %v902_v54 = vpop.eup %901 }
 0x2e2   : > { %v640_v25 = vadd.f32 1.0, %v902_v54 }
 0x2e4   : > { %903 = vrcp.f32 %v640_v25 }
 0x2ee   : > { %v904_v55 = vpop.eup %903 }
 0x345   : > { %v645_v56 = vpop.permute.xlu0 %644 }
 0x346   : > { %v647_v57 = vmul.f32 %v904_v55, %v645_v56 }
 0x348   : > { %649 = vrot.lane.b32.xlu1 %v647_v57, %s924_s26 }
 0x349   : > { %v678_v58 = vpop.permute.xlu0 %677 }
 0x34a   : > { %v680_v59 = vmul.f32 %v904_v55, %v678_v58 }
 0x34c   : > { %682 = vrot.lane.b32.xlu1 %v680_v59, %s924_s26 }
 0x3ba   : > { %v650_v60 = vpop.permute.xlu1 %649 }
 0x3bb   : > { %v652_v61 = vadd.f32 %v650_v60, %v547_v52 }
 0x3bd   : > { %905 = vtanh.f32 %v652_v61 }
 0x3be   : > { %v683_v62 = vpop.permute.xlu1 %682 }
 0x3bf   : > { %v685_v63 = vadd.f32 %v683_v62, %v634_v49 }
 0x3c1   : > { %907 = vtanh.f32 %v685_v63 }
 0x3c2   : > { %909 = vpow2.f32 %v838_v34 }
 0x3c7   : > { %v906_v0 = vpop.eup %905 }
 0x3c8   : > { %655 = vrot.lane.b32.xlu0 %v906_v0, %s924_s26 }
 0x3cb   : > { %v908_v26 = vpop.eup %907 }
 0x3cc   : > { %688 = vrot.lane.b32.xlu1 %v908_v26, %s925_s27  ;;  %v910_v31 = vpop.eup %909 }
 0x3cd   : > { %v673_v29 = vadd.f32 1.0, %v910_v31 }
 0x3cf   : > { %911 = vrcp.f32 %v673_v29 }
 0x3d9   : > { %v912_v37 = vpop.eup %911 }
 0x43a   : > { %v656_v30 = vpop.permute.xlu0 %655 }
 0x43b   : > { %v658_v32 = vsub.f32 %v464_v40, %v656_v30  ;;  %v877_v40 = vpack.c.bf16 %v1117_v22, %v1112_v21 }
 0x43d   : > { %660 = vrot.lane.b32.xlu0 %v658_v32, %s926_s28  ;;  %878 = vmatpush3.bf16.msra.mxu0 %v877_v40 }
 0x43e   : > { %v689_v33 = vpop.permute.xlu1 %688 }
 0x43f   : > { %v691_v36 = vsub.f32 %v1136_v24, %v689_v33 }
 0x441   : > { %v692_v38 = vmul.f32 %v912_v37, %v691_v36 }
 0x443   : > { %694 = vrot.lane.b32.xlu1 %v692_v38, %s926_s28 }
 0x4af   : > { %v661_v43 = vpop.permute.xlu0 %660 }
 0x4b0   : > { %v663_v39 = vmul.f32 %v904_v55, %v661_v43 }
 0x4b2   : > { %665 = vrot.lane.b32.xlu0 %v663_v39, %s926_s28 }
 0x4b5   : > { %v695_v24 = vpop.permute.xlu1 %694 }
 0x4b6   : > { %v697_v41 = vadd.f32 %v908_v26, %v695_v24 }
 0x4b8   : > { %699 = vrot.lane.b32.xlu1 %v697_v41, %s926_s28 }
 0x4bc   : > { %794 = vrot.lane.b32.xlu1 %v1122_v23, %s924_s26 }
 0x524   : > { %v666_v47 = vpop.permute.xlu0 %665 }
 0x525   : > { %v668_v28 = vadd.f32 %v906_v0, %v666_v47 }
 0x52a   : > { %v700_v44 = vpop.permute.xlu1 %699 }
 0x52b   : > { %v702_v48 = vadd.f32 %v700_v44, %v668_v28 }
 0x52d   : > { %704 = vrot.lane.b32.xlu0 %v702_v48, %s924_s26 }
 0x52e   : > { %v795_v49 = vpop.permute.xlu1 %794 }
 0x52f   : > { %v797_v50 = vmul.f32 %v795_v49, %v702_v48 }
 0x531   : > { %799 = vrot.lane.b32.xlu0 %v797_v50, %s924_s26 }
 0x59f   : > { %v705_v35 = vpop.permute.xlu0 %704 }
 0x5a0   : > { %708 = vst.msk [vmem:[%s707_s11] sm:$0x3] %vm35_vm0, %v705_v35  ;;  %855 = vmatmul.mubr.msk.f32.vlgmr.msra.gmra.mrb[2].mxu0 %vm476_vm11, %v705_v35 }
 0x5a3   : > { %v800_v51 = vpop.permute.xlu0 %799 }
 0x5a4   : > { %v802_v52 = vsel %vm35_vm0, %v800_v51, 0.0 }
 0x5a5   : > { %803 = vadd.xlane.f32.xlu1 %v802_v52 }
 0x632   : > { %v804_v42 = vpop.xlane.xlu1 %803 }
 0x633   : > { %806 = vst.msk [vmem:[%s805_s12] sm:$0x3] %vm53_vm1, %v804_v42 }
 0x673   : > { %v777_v53 = vpop.f32.mrb[2].mxu0 }
 0x674   : > { %782 = vst.msk [vmem:[%s781_s6] sm:$0x3] %vm35_vm0, %v777_v53  ;;  %v856_v54 = vpop.f32.mrb[3].mxu0  ;;  %784 = vrot.lane.b32.xlu0 %v777_v53, %s925_s27 }
 0x6e1   :  { %89 = sbr.rel (!%p87_p1) target bundleno = 14 (0xe), region = 79 }
 0x6e6   : > { %v785_v25 = vpop.permute.xlu0 %784 }
 0x6e7   : > { %788 = vst.msk [vmem:[%s787_s13] sm:$0x3] %vm35_vm0, %v785_v25 }

</bundles_post_ra>
